<compile_context>
chip_gen: v5e
topology: v5e:2x2
jax: 0.10.0
libtpu: 0.0.40
codegen_flags: <defaults>
</compile_context>

<pallas_src>
import functools

import jax
import jax.numpy as jnp
from jax.experimental import pallas as pl
from jax.experimental.pallas import tpu as pltpu


def _round_up(x, m):
    return (x + m - 1) // m * m


def _bisenet_output_kernel(x_hbm, w_ref, b_ref, wout_ref, o_ref, xbuf, sem, *,
                           tile, halo, wp, win):
    """One (batch, spatial-tile) grid step.

    x_hbm:    (B, C_in, L) bf16 in HBM (guarded flat layout, front/back padded)
    w_ref:    (3, C_mid, 3*C_in) bf16   BN-folded 3x3 weights, K-packed over dx
    b_ref:    (C_mid, 1) f32            BN-folded per-channel bias
    wout_ref: (NCp, C_mid) bf16         1x1 conv weights (classes padded to 8)
    o_ref:    (1, NCp, T) f32           output tile (lane-dense, T % 128 == 0)
    xbuf:     (2, C_in, WIN) bf16       double-buffered halo window (VMEM)
    sem:      (2,) DMA semaphores
    """
    b = pl.program_id(0)
    t = pl.program_id(1)
    nt = pl.num_programs(1)
    slot = t % 2

    def fetch(tile_idx, slot_idx):
        start = pl.multiple_of(tile_idx * tile, 128)
        pltpu.make_async_copy(
            x_hbm.at[b, :, pl.ds(start, win)],
            xbuf.at[slot_idx],
            sem.at[slot_idx],
        ).start()

    # First tile of each batch: nobody prefetched for us -> fetch our own.
    @pl.when(t == 0)
    def _():
        fetch(t, slot)

    # Wait for the current tile's window (issued above at t == 0, otherwise
    # issued as a prefetch by the previous grid step of this batch).
    pltpu.make_async_copy(
        x_hbm.at[b, :, pl.ds(0, win)], xbuf.at[slot], sem.at[slot]).wait()

    # Prefetch the next tile of the same batch into the other slot so its DMA
    # overlaps this tile's compute.
    @pl.when(t + 1 < nt)
    def _():
        fetch(t + 1, 1 - slot)

    win_ref = xbuf.at[slot]                      # (C_in, WIN) bf16 view
    c_mid = w_ref.shape[1]

    # 3x3 conv as 3 matmuls (one per dy), K-packed over dx.  The guard-column
    # layout guarantees every tap slice is in-bounds and needs no masking.
    acc = jnp.zeros((c_mid, tile), jnp.float32)
    for ky in range(3):                          # dy = ky - 1
        parts = []
        for kx in range(3):                      # dx = kx - 1
            s0 = halo + (ky - 1) * wp + (kx - 1)          # static slice start
            parts.append(win_ref[:, s0:s0 + tile])        # (C_in, T) bf16
        xs = jnp.concatenate(parts, axis=0)               # (3*C_in, T) bf16
        acc = acc + jnp.dot(w_ref[ky], xs,
                            preferred_element_type=jnp.float32)

    mid = jnp.maximum(acc + b_ref[...], 0.0).astype(jnp.bfloat16)  # BN + ReLU
    out = jnp.dot(wout_ref[...], mid, preferred_element_type=jnp.float32)
    o_ref[0] = out.astype(o_ref.dtype)


def bisenet_output_forward(x, conv_w, bn_gamma, bn_beta, bn_mean, bn_var,
                           convout_w, eps=1e-5, lane_block=1024):
    """x: (B, C_in, H, W); conv_w: (C_mid, C_in, 3, 3);
    convout_w: (n_classes, C_mid, 1, 1).  Returns (B, n_classes, H, W).

    lane_block: spatial tile size in lanes (rounded to a multiple of 128).
    Keep C_mid * lane_block * 4B (the f32 accumulator) modest (<~256 KB) and
    2 * C_in * (lane_block + 2*HALO) * 2B (the double-buffered x window) well
    inside the ~32 MiB scoped-VMEM budget (v7x has only 64 MiB physical).
    """
    B, C_in, H, W = x.shape
    C_mid = conv_w.shape[0]
    n_classes = convout_w.shape[0]

    # Guarded flat layout: one zero guard row/col on every side of the image,
    # rows laid out with stride Wp on the lane axis.
    Wp = W + 2
    Hp = H + 2
    NQ = Hp * Wp                                    # guarded flat length
    T = _round_up(min(lane_block, _round_up(NQ, 128)), 128)
    n_tiles = (NQ + T - 1) // T
    NQ_pad = n_tiles * T                            # lane-dense output length
    HALO = _round_up(Wp + 1, 128)                   # halo lanes per side
    WIN = T + 2 * HALO                              # DMA window per tile
    L = NQ_pad + 2 * HALO                           # padded flat x length
    NCp = _round_up(n_classes, 8)                   # sublane-friendly classes

    # Fold eval-mode BN into the 3x3 conv weights + a per-channel bias.
    scale = bn_gamma / jnp.sqrt(bn_var + eps)                      # (C_mid,)
    bias = bn_beta - bn_mean * scale                               # (C_mid,)
    wf = conv_w * scale[:, None, None, None]                       # (C_mid,C_in,3,3)
    # K-pack the 3 dx taps of each dy: (3, C_mid, 3*C_in), bf16 for the MXU.
    w_packed = jnp.stack(
        [jnp.concatenate([wf[:, :, ky, kx] for kx in range(3)], axis=1)
         for ky in range(3)], axis=0).astype(jnp.bfloat16)
    b_col = bias.reshape(C_mid, 1).astype(jnp.float32)
    wout = convout_w.reshape(n_classes, C_mid)
    wout_p = jnp.zeros((NCp, C_mid), wout.dtype).at[:n_classes].set(wout)
    wout_p = wout_p.astype(jnp.bfloat16)

    # Build the guarded, flattened, halo-padded activations (bf16).
    x_g = jnp.pad(x, ((0, 0), (0, 0), (1, 1), (1, 1)))             # (B,C_in,Hp,Wp)
    x_flat = x_g.reshape(B, C_in, NQ)
    x_pad = jnp.pad(x_flat, ((0, 0), (0, 0), (HALO, L - NQ - HALO)))
    x_pad = x_pad.astype(jnp.bfloat16)                             # (B,C_in,L)

    kernel = functools.partial(_bisenet_output_kernel, tile=T, halo=HALO,
                               wp=Wp, win=WIN)

    flops = 2 * B * NQ_pad * C_mid * (9 * C_in + NCp)
    bytes_accessed = (x_pad.size * 2 + B * NCp * NQ_pad * 4
                      + w_packed.size * 2 + wout_p.size * 2 + b_col.size * 4)

    out = pl.pallas_call(
        kernel,
        out_shape=jax.ShapeDtypeStruct((B, NCp, NQ_pad), jnp.float32),
        grid_spec=pltpu.PrefetchScalarGridSpec(
            num_scalar_prefetch=0,
            grid=(B, n_tiles),
            in_specs=[
                pl.BlockSpec(memory_space=pl.ANY),                       # x stays in HBM
                pl.BlockSpec((3, C_mid, 3 * C_in), lambda b, t: (0, 0, 0)),
                pl.BlockSpec((C_mid, 1), lambda b, t: (0, 0)),
                pl.BlockSpec((NCp, C_mid), lambda b, t: (0, 0)),
            ],
            out_specs=pl.BlockSpec((1, NCp, T), lambda b, t: (b, 0, t)),
            scratch_shapes=[
                pltpu.VMEM((2, C_in, WIN), jnp.bfloat16),  # double-buffered window
                pltpu.SemaphoreType.DMA((2,)),
            ]),
        compiler_params=pltpu.CompilerParams(
            dimension_semantics=("parallel", "arbitrary"),
            allow_input_fusion=[True, False, False, False]),
        cost_estimate=pl.CostEstimate(flops=flops, transcendentals=0,
                                      bytes_accessed=bytes_accessed),
    )(x_pad, w_packed, b_col, wout_p)

    out = out[:, :n_classes, :NQ].reshape(B, n_classes, Hp, Wp)
    return out[:, :, 1:H + 1, 1:W + 1]


def bisenet_output_reference(x, conv_w, bn_gamma, bn_beta, bn_mean, bn_var,
                             convout_w, eps=1e-5):
    """Pure-JAX replica of the PyTorch forward (eval-mode BN) for verification."""
    B, C_in, H, W = x.shape
    C_mid = conv_w.shape[0]
    xp = jnp.pad(x, ((0, 0), (0, 0), (1, 1), (1, 1)))
    y = jnp.zeros((B, C_mid, H, W), jnp.float32)
    for ky in range(3):
        for kx in range(3):
            y = y + jnp.einsum('oi,bihw->bohw', conv_w[:, :, ky, kx],
                               xp[:, :, ky:ky + H, kx:kx + W],
                               precision=jax.lax.Precision.HIGHEST)
    scale = bn_gamma / jnp.sqrt(bn_var + eps)
    shift = bn_beta - bn_mean * scale
    y = jnp.maximum(y * scale[None, :, None, None] + shift[None, :, None, None], 0.0)
    out = jnp.einsum('oc,bchw->bohw', convout_w[:, :, 0, 0], y,
                     precision=jax.lax.Precision.HIGHEST)
    return out


if __name__ == "__main__":
    B, C_in, C_mid, n_classes, H, W = 2, 16, 32, 8, 16, 16

    key = jax.random.PRNGKey(0)
    kx, kw, kg, kb, km, kv, ko = jax.random.split(key, 7)

    x = jax.random.normal(kx, (B, C_in, H, W), dtype=jnp.float32)
    conv_w = 0.1 * jax.random.normal(kw, (C_mid, C_in, 3, 3), dtype=jnp.float32)
    # Non-trivial eval-mode BatchNorm parameters so the BN fold is exercised.
    bn_gamma = 1.0 + 0.1 * jax.random.normal(kg, (C_mid,), dtype=jnp.float32)
    bn_beta = 0.1 * jax.random.normal(kb, (C_mid,), dtype=jnp.float32)
    bn_mean = 0.1 * jax.random.normal(km, (C_mid,), dtype=jnp.float32)
    bn_var = 0.5 + jnp.abs(jax.random.normal(kv, (C_mid,), dtype=jnp.float32))
    convout_w = 0.1 * jax.random.normal(ko, (n_classes, C_mid, 1, 1),
                                        dtype=jnp.float32)

    ref = bisenet_output_reference(x, conv_w, bn_gamma, bn_beta, bn_mean,
                                   bn_var, convout_w)

    # Expected error vs. the f32 HIGHEST reference is a few 1e-3 from the bf16
    # MXU operands; 3e-2 tolerance leaves ample margin.
    for lb in (256, 1024):   # multi-tile and single-tile spatial pipelines
        out = bisenet_output_forward(x, conv_w, bn_gamma, bn_beta, bn_mean,
                                     bn_var, convout_w, lane_block=lb)
        out = jax.block_until_ready(out)
        if out.shape != (B, n_classes, H, W):
            raise AssertionError(f"bad output shape {out.shape} (lane_block={lb})")
        if not jnp.allclose(out, ref, atol=3e-2, rtol=3e-2):
            err = jnp.max(jnp.abs(out - ref))
            raise AssertionError(
                f"Pallas BiSeNetOutput kernel mismatch (lane_block={lb}), "
                f"max |err| = {err}")

    print("KERNEL_OK")
</pallas_src>

<mosaic_0001>
module attributes {stable_mosaic.version = 11 : i64} {
  func.func @_bisenet_output_kernel(%arg0: i32, %arg1: i32, %arg2: memref<2x16x768xbf16, #tpu.memory_space<any>>, %arg3: memref<3x32x48xbf16, #tpu.memory_space<vmem>>, %arg4: memref<32x1xf32, #tpu.memory_space<vmem>>, %arg5: memref<8x32xbf16, #tpu.memory_space<vmem>>, %arg6: memref<1x8x256xf32, #tpu.memory_space<vmem>>, %arg7: memref<2x16x512xbf16, #tpu.memory_space<vmem>>, %arg8: memref<2x!tpu.dma_semaphore, #tpu.memory_space<semaphore_mem>>) attributes {dimension_semantics = [#tpu.dimension_semantics<parallel>, #tpu.dimension_semantics<arbitrary>], iteration_bounds = array<i64: 2, 2>, scalar_prefetch = 0 : i64, scratch_operands = 2 : i64, tpu.core_type = #tpu.core_type<tc>, window_params = [{}, {pipeline_mode = #tpu.pipeline_mode<synchronous>, transform_indices = @transform_1, window_bounds = array<i64: 3, 32, 48>}, {pipeline_mode = #tpu.pipeline_mode<synchronous>, transform_indices = @transform_2, window_bounds = array<i64: 32, 1>}, {pipeline_mode = #tpu.pipeline_mode<synchronous>, transform_indices = @transform_3, window_bounds = array<i64: 8, 32>}, {transform_indices = @transform_4, window_bounds = array<i64: 1, 8, 256>}]} {
    %c2_i32 = arith.constant 2 : i32
    %c0_i32 = arith.constant 0 : i32
    %0 = arith.cmpi eq, %c2_i32, %c0_i32 : i32
    %c1_i32 = arith.constant 1 : i32
    %1 = arith.select %0, %c1_i32, %c2_i32 : i32
    %2 = arith.remsi %arg1, %1 : i32
    %c0_i32_0 = arith.constant 0 : i32
    %3 = arith.cmpi ne, %2, %c0_i32_0 : i32
    %c0_i32_1 = arith.constant 0 : i32
    %4 = arith.cmpi slt, %2, %c0_i32_1 : i32
    %c0_i32_2 = arith.constant 0 : i32
    %5 = arith.cmpi slt, %1, %c0_i32_2 : i32
    %6 = arith.xori %4, %5 : i1
    %7 = arith.andi %6, %3 : i1
    %8 = arith.addi %2, %1 : i32
    %9 = arith.select %7, %8, %2 : i32
    %c0_i32_3 = arith.constant 0 : i32
    %10 = arith.cmpi eq, %arg1, %c0_i32_3 : i32
    %11 = arith.extui %10 : i1 to i32
    %c0_i32_4 = arith.constant 0 : i32
    %12 = arith.cmpi ne, %11, %c0_i32_4 : i32
    scf.if %12 {
      %c256_i32 = arith.constant 256 : i32
      %77 = arith.muli %arg1, %c256_i32 : i32
      %78 = tpu.assume_multiple %77, 128 : i32
      %c0_i32_57 = arith.constant 0 : i32
      %79 = tpu.memref_slice %arg2[%arg0, %c0_i32_57, %78] : memref<2x16x768xbf16, #tpu.memory_space<any>> -> memref<1x16x512xbf16, #tpu.memory_space<any>>
      %80 = tpu.memref_squeeze %79 : memref<1x16x512xbf16, #tpu.memory_space<any>> -> memref<16x512xbf16, #tpu.memory_space<any>>
      %c0_i32_58 = arith.constant 0 : i32
      %c0_i32_59 = arith.constant 0 : i32
      %81 = tpu.memref_slice %arg7[%9, %c0_i32_58, %c0_i32_59] : memref<2x16x512xbf16, #tpu.memory_space<vmem>> -> memref<1x16x512xbf16, #tpu.memory_space<vmem>>
      %82 = tpu.memref_squeeze %81 : memref<1x16x512xbf16, #tpu.memory_space<vmem>> -> memref<16x512xbf16, #tpu.memory_space<vmem>>
      %83 = tpu.memref_slice %arg8[%9] : memref<2x!tpu.dma_semaphore, #tpu.memory_space<semaphore_mem>> -> memref<1x!tpu.dma_semaphore, #tpu.memory_space<semaphore_mem>>
      %84 = tpu.memref_squeeze %83 : memref<1x!tpu.dma_semaphore, #tpu.memory_space<semaphore_mem>> -> memref<!tpu.dma_semaphore, #tpu.memory_space<semaphore_mem>>
      tpu.enqueue_dma source(%80 : memref<16x512xbf16, #tpu.memory_space<any>>) target(%82 : memref<16x512xbf16, #tpu.memory_space<vmem>>) target_semaphore(%84 : memref<!tpu.dma_semaphore, #tpu.memory_space<semaphore_mem>>)
    } else {
    }
    %c0_i32_5 = arith.constant 0 : i32
    %c0_i32_6 = arith.constant 0 : i32
    %13 = tpu.memref_slice %arg2[%arg0, %c0_i32_5, %c0_i32_6] : memref<2x16x768xbf16, #tpu.memory_space<any>> -> memref<1x16x512xbf16, #tpu.memory_space<any>>
    %14 = tpu.memref_squeeze %13 : memref<1x16x512xbf16, #tpu.memory_space<any>> -> memref<16x512xbf16, #tpu.memory_space<any>>
    %c0_i32_7 = arith.constant 0 : i32
    %c0_i32_8 = arith.constant 0 : i32
    %15 = tpu.memref_slice %arg7[%9, %c0_i32_7, %c0_i32_8] : memref<2x16x512xbf16, #tpu.memory_space<vmem>> -> memref<1x16x512xbf16, #tpu.memory_space<vmem>>
    %16 = tpu.memref_squeeze %15 : memref<1x16x512xbf16, #tpu.memory_space<vmem>> -> memref<16x512xbf16, #tpu.memory_space<vmem>>
    %17 = tpu.memref_slice %arg8[%9] : memref<2x!tpu.dma_semaphore, #tpu.memory_space<semaphore_mem>> -> memref<1x!tpu.dma_semaphore, #tpu.memory_space<semaphore_mem>>
    %18 = tpu.memref_squeeze %17 : memref<1x!tpu.dma_semaphore, #tpu.memory_space<semaphore_mem>> -> memref<!tpu.dma_semaphore, #tpu.memory_space<semaphore_mem>>
    tpu.wait_dma2 semaphore(%18 : memref<!tpu.dma_semaphore, #tpu.memory_space<semaphore_mem>>) src(%14 : memref<16x512xbf16, #tpu.memory_space<any>>) dst(%16 : memref<16x512xbf16, #tpu.memory_space<vmem>>)
    %c1_i32_9 = arith.constant 1 : i32
    %19 = arith.addi %arg1, %c1_i32_9 : i32
    %c2_i32_10 = arith.constant 2 : i32
    %20 = arith.cmpi slt, %19, %c2_i32_10 : i32
    %21 = arith.extui %20 : i1 to i32
    %c0_i32_11 = arith.constant 0 : i32
    %22 = arith.cmpi ne, %21, %c0_i32_11 : i32
    scf.if %22 {
      %c1_i32_57 = arith.constant 1 : i32
      %77 = arith.addi %arg1, %c1_i32_57 : i32
      %c1_i32_58 = arith.constant 1 : i32
      %78 = arith.subi %c1_i32_58, %9 : i32
      %c256_i32 = arith.constant 256 : i32
      %79 = arith.muli %77, %c256_i32 : i32
      %80 = tpu.assume_multiple %79, 128 : i32
      %c0_i32_59 = arith.constant 0 : i32
      %81 = tpu.memref_slice %arg2[%arg0, %c0_i32_59, %80] : memref<2x16x768xbf16, #tpu.memory_space<any>> -> memref<1x16x512xbf16, #tpu.memory_space<any>>
      %82 = tpu.memref_squeeze %81 : memref<1x16x512xbf16, #tpu.memory_space<any>> -> memref<16x512xbf16, #tpu.memory_space<any>>
      %c0_i32_60 = arith.constant 0 : i32
      %c0_i32_61 = arith.constant 0 : i32
      %83 = tpu.memref_slice %arg7[%78, %c0_i32_60, %c0_i32_61] : memref<2x16x512xbf16, #tpu.memory_space<vmem>> -> memref<1x16x512xbf16, #tpu.memory_space<vmem>>
      %84 = tpu.memref_squeeze %83 : memref<1x16x512xbf16, #tpu.memory_space<vmem>> -> memref<16x512xbf16, #tpu.memory_space<vmem>>
      %85 = tpu.memref_slice %arg8[%78] : memref<2x!tpu.dma_semaphore, #tpu.memory_space<semaphore_mem>> -> memref<1x!tpu.dma_semaphore, #tpu.memory_space<semaphore_mem>>
      %86 = tpu.memref_squeeze %85 : memref<1x!tpu.dma_semaphore, #tpu.memory_space<semaphore_mem>> -> memref<!tpu.dma_semaphore, #tpu.memory_space<semaphore_mem>>
      tpu.enqueue_dma source(%82 : memref<16x512xbf16, #tpu.memory_space<any>>) target(%84 : memref<16x512xbf16, #tpu.memory_space<vmem>>) target_semaphore(%86 : memref<!tpu.dma_semaphore, #tpu.memory_space<semaphore_mem>>)
    } else {
    }
    %cst = arith.constant 0.000000e+00 : f32
    %23 = vector.broadcast %cst : f32 to vector<32x256xf32>
    %c0_i32_12 = arith.constant 0 : i32
    %c0_i32_13 = arith.constant 0 : i32
    %24 = tpu.memref_slice %arg7[%9, %c0_i32_12, %c0_i32_13] : memref<2x16x512xbf16, #tpu.memory_space<vmem>> -> memref<1x16x512xbf16, #tpu.memory_space<vmem>>
    %25 = tpu.memref_squeeze %24 : memref<1x16x512xbf16, #tpu.memory_space<vmem>> -> memref<16x512xbf16, #tpu.memory_space<vmem>>
    %c0 = arith.constant 0 : index
    %c109 = arith.constant 109 : index
    %26 = vector.load %25[%c0, %c109] : memref<16x512xbf16, #tpu.memory_space<vmem>>, vector<16x256xbf16>
    %c0_i32_14 = arith.constant 0 : i32
    %c0_i32_15 = arith.constant 0 : i32
    %27 = tpu.memref_slice %arg7[%9, %c0_i32_14, %c0_i32_15] : memref<2x16x512xbf16, #tpu.memory_space<vmem>> -> memref<1x16x512xbf16, #tpu.memory_space<vmem>>
    %28 = tpu.memref_squeeze %27 : memref<1x16x512xbf16, #tpu.memory_space<vmem>> -> memref<16x512xbf16, #tpu.memory_space<vmem>>
    %c0_16 = arith.constant 0 : index
    %c110 = arith.constant 110 : index
    %29 = vector.load %28[%c0_16, %c110] : memref<16x512xbf16, #tpu.memory_space<vmem>>, vector<16x256xbf16>
    %c0_i32_17 = arith.constant 0 : i32
    %c0_i32_18 = arith.constant 0 : i32
    %30 = tpu.memref_slice %arg7[%9, %c0_i32_17, %c0_i32_18] : memref<2x16x512xbf16, #tpu.memory_space<vmem>> -> memref<1x16x512xbf16, #tpu.memory_space<vmem>>
    %31 = tpu.memref_squeeze %30 : memref<1x16x512xbf16, #tpu.memory_space<vmem>> -> memref<16x512xbf16, #tpu.memory_space<vmem>>
    %c0_19 = arith.constant 0 : index
    %c111 = arith.constant 111 : index
    %32 = vector.load %31[%c0_19, %c111] : memref<16x512xbf16, #tpu.memory_space<vmem>>, vector<16x256xbf16>
    %33 = tpu.concatenate %26, %29, %32 in 0 : vector<16x256xbf16>, vector<16x256xbf16>, vector<16x256xbf16> -> vector<48x256xbf16>
    %c0_20 = arith.constant 0 : index
    %c0_21 = arith.constant 0 : index
    %c0_22 = arith.constant 0 : index
    %34 = vector.load %arg3[%c0_20, %c0_21, %c0_22] : memref<3x32x48xbf16, #tpu.memory_space<vmem>>, vector<1x32x48xbf16>
    %35 = vector.shape_cast %34 : vector<1x32x48xbf16> to vector<32x48xbf16>
    %cst_23 = arith.constant dense<0.000000e+00> : vector<32x256xf32>
    %36 = tpu.matmul %35, %33, %cst_23 {dimension_numbers = #tpu.dot_dimension_numbers<[1], [0], [0], [1], [0, 0, 1, 1], [], []>} : vector<32x48xbf16>, vector<48x256xbf16>, vector<32x256xf32> -> vector<32x256xf32>
    %37 = arith.addf %23, %36 : vector<32x256xf32>
    %c0_i32_24 = arith.constant 0 : i32
    %c0_i32_25 = arith.constant 0 : i32
    %38 = tpu.memref_slice %arg7[%9, %c0_i32_24, %c0_i32_25] : memref<2x16x512xbf16, #tpu.memory_space<vmem>> -> memref<1x16x512xbf16, #tpu.memory_space<vmem>>
    %39 = tpu.memref_squeeze %38 : memref<1x16x512xbf16, #tpu.memory_space<vmem>> -> memref<16x512xbf16, #tpu.memory_space<vmem>>
    %c0_26 = arith.constant 0 : index
    %c127 = arith.constant 127 : index
    %40 = vector.load %39[%c0_26, %c127] : memref<16x512xbf16, #tpu.memory_space<vmem>>, vector<16x256xbf16>
    %c0_i32_27 = arith.constant 0 : i32
    %c0_i32_28 = arith.constant 0 : i32
    %41 = tpu.memref_slice %arg7[%9, %c0_i32_27, %c0_i32_28] : memref<2x16x512xbf16, #tpu.memory_space<vmem>> -> memref<1x16x512xbf16, #tpu.memory_space<vmem>>
    %42 = tpu.memref_squeeze %41 : memref<1x16x512xbf16, #tpu.memory_space<vmem>> -> memref<16x512xbf16, #tpu.memory_space<vmem>>
    %c0_29 = arith.constant 0 : index
    %c128 = arith.constant 128 : index
    %43 = vector.load %42[%c0_29, %c128] : memref<16x512xbf16, #tpu.memory_space<vmem>>, vector<16x256xbf16>
    %c0_i32_30 = arith.constant 0 : i32
    %c0_i32_31 = arith.constant 0 : i32
    %44 = tpu.memref_slice %arg7[%9, %c0_i32_30, %c0_i32_31] : memref<2x16x512xbf16, #tpu.memory_space<vmem>> -> memref<1x16x512xbf16, #tpu.memory_space<vmem>>
    %45 = tpu.memref_squeeze %44 : memref<1x16x512xbf16, #tpu.memory_space<vmem>> -> memref<16x512xbf16, #tpu.memory_space<vmem>>
    %c0_32 = arith.constant 0 : index
    %c129 = arith.constant 129 : index
    %46 = vector.load %45[%c0_32, %c129] : memref<16x512xbf16, #tpu.memory_space<vmem>>, vector<16x256xbf16>
    %47 = tpu.concatenate %40, %43, %46 in 0 : vector<16x256xbf16>, vector<16x256xbf16>, vector<16x256xbf16> -> vector<48x256xbf16>
    %c1 = arith.constant 1 : index
    %c0_33 = arith.constant 0 : index
    %c0_34 = arith.constant 0 : index
    %48 = vector.load %arg3[%c1, %c0_33, %c0_34] : memref<3x32x48xbf16, #tpu.memory_space<vmem>>, vector<1x32x48xbf16>
    %49 = vector.shape_cast %48 : vector<1x32x48xbf16> to vector<32x48xbf16>
    %cst_35 = arith.constant dense<0.000000e+00> : vector<32x256xf32>
    %50 = tpu.matmul %49, %47, %cst_35 {dimension_numbers = #tpu.dot_dimension_numbers<[1], [0], [0], [1], [0, 0, 1, 1], [], []>} : vector<32x48xbf16>, vector<48x256xbf16>, vector<32x256xf32> -> vector<32x256xf32>
    %51 = arith.addf %37, %50 : vector<32x256xf32>
    %c0_i32_36 = arith.constant 0 : i32
    %c0_i32_37 = arith.constant 0 : i32
    %52 = tpu.memref_slice %arg7[%9, %c0_i32_36, %c0_i32_37] : memref<2x16x512xbf16, #tpu.memory_space<vmem>> -> memref<1x16x512xbf16, #tpu.memory_space<vmem>>
    %53 = tpu.memref_squeeze %52 : memref<1x16x512xbf16, #tpu.memory_space<vmem>> -> memref<16x512xbf16, #tpu.memory_space<vmem>>
    %c0_38 = arith.constant 0 : index
    %c145 = arith.constant 145 : index
    %54 = vector.load %53[%c0_38, %c145] : memref<16x512xbf16, #tpu.memory_space<vmem>>, vector<16x256xbf16>
    %c0_i32_39 = arith.constant 0 : i32
    %c0_i32_40 = arith.constant 0 : i32
    %55 = tpu.memref_slice %arg7[%9, %c0_i32_39, %c0_i32_40] : memref<2x16x512xbf16, #tpu.memory_space<vmem>> -> memref<1x16x512xbf16, #tpu.memory_space<vmem>>
    %56 = tpu.memref_squeeze %55 : memref<1x16x512xbf16, #tpu.memory_space<vmem>> -> memref<16x512xbf16, #tpu.memory_space<vmem>>
    %c0_41 = arith.constant 0 : index
    %c146 = arith.constant 146 : index
    %57 = vector.load %56[%c0_41, %c146] : memref<16x512xbf16, #tpu.memory_space<vmem>>, vector<16x256xbf16>
    %c0_i32_42 = arith.constant 0 : i32
    %c0_i32_43 = arith.constant 0 : i32
    %58 = tpu.memref_slice %arg7[%9, %c0_i32_42, %c0_i32_43] : memref<2x16x512xbf16, #tpu.memory_space<vmem>> -> memref<1x16x512xbf16, #tpu.memory_space<vmem>>
    %59 = tpu.memref_squeeze %58 : memref<1x16x512xbf16, #tpu.memory_space<vmem>> -> memref<16x512xbf16, #tpu.memory_space<vmem>>
    %c0_44 = arith.constant 0 : index
    %c147 = arith.constant 147 : index
    %60 = vector.load %59[%c0_44, %c147] : memref<16x512xbf16, #tpu.memory_space<vmem>>, vector<16x256xbf16>
    %61 = tpu.concatenate %54, %57, %60 in 0 : vector<16x256xbf16>, vector<16x256xbf16>, vector<16x256xbf16> -> vector<48x256xbf16>
    %c2 = arith.constant 2 : index
    %c0_45 = arith.constant 0 : index
    %c0_46 = arith.constant 0 : index
    %62 = vector.load %arg3[%c2, %c0_45, %c0_46] : memref<3x32x48xbf16, #tpu.memory_space<vmem>>, vector<1x32x48xbf16>
    %63 = vector.shape_cast %62 : vector<1x32x48xbf16> to vector<32x48xbf16>
    %cst_47 = arith.constant dense<0.000000e+00> : vector<32x256xf32>
    %64 = tpu.matmul %63, %61, %cst_47 {dimension_numbers = #tpu.dot_dimension_numbers<[1], [0], [0], [1], [0, 0, 1, 1], [], []>} : vector<32x48xbf16>, vector<48x256xbf16>, vector<32x256xf32> -> vector<32x256xf32>
    %65 = arith.addf %51, %64 : vector<32x256xf32>
    %c0_48 = arith.constant 0 : index
    %c0_49 = arith.constant 0 : index
    %66 = vector.load %arg4[%c0_48, %c0_49] : memref<32x1xf32, #tpu.memory_space<vmem>>, vector<32x1xf32>
    %67 = vector.broadcast %66 : vector<32x1xf32> to vector<32x256xf32>
    %68 = arith.addf %65, %67 : vector<32x256xf32>
    %cst_50 = arith.constant 0.000000e+00 : f32
    %69 = vector.broadcast %cst_50 : f32 to vector<32x256xf32>
    %70 = arith.maximumf %68, %69 : vector<32x256xf32>
    %71 = arith.truncf %70 : vector<32x256xf32> to vector<32x256xbf16>
    %c0_51 = arith.constant 0 : index
    %c0_52 = arith.constant 0 : index
    %72 = vector.load %arg5[%c0_51, %c0_52] : memref<8x32xbf16, #tpu.memory_space<vmem>>, vector<8x32xbf16>
    %cst_53 = arith.constant dense<0.000000e+00> : vector<8x256xf32>
    %73 = tpu.matmul %72, %71, %cst_53 {dimension_numbers = #tpu.dot_dimension_numbers<[1], [0], [0], [1], [0, 0, 1, 1], [], []>} : vector<8x32xbf16>, vector<32x256xbf16>, vector<8x256xf32> -> vector<8x256xf32>
    %c0_54 = arith.constant 0 : index
    %c0_55 = arith.constant 0 : index
    %c0_56 = arith.constant 0 : index
    %74 = vector.load %arg6[%c0_54, %c0_55, %c0_56] : memref<1x8x256xf32, #tpu.memory_space<vmem>>, vector<1x8x256xf32>
    %75 = vector.shape_cast %74 : vector<1x8x256xf32> to vector<8x256xf32>
    %76 = vector.shape_cast %73 : vector<8x256xf32> to vector<1x8x256xf32>
    tpu.vector_store %arg6[%c0_54, %c0_55, %c0_56], %76 {strides = array<i32>} : memref<1x8x256xf32, #tpu.memory_space<vmem>>, vector<1x8x256xf32>,
    return
  }
  func.func @transform_1(%arg0: i32, %arg1: i32) -> (i32, i32, i32) {
    %c0_i32 = arith.constant 0 : i32
    %c0_i32_0 = arith.constant 0 : i32
    %c0_i32_1 = arith.constant 0 : i32
    %c0_i32_2 = arith.constant 0 : i32
    return %c0_i32, %c0_i32_0, %c0_i32_1 : i32, i32, i32
  }
  func.func @transform_2(%arg0: i32, %arg1: i32) -> (i32, i32) {
    %c0_i32 = arith.constant 0 : i32
    %c0_i32_0 = arith.constant 0 : i32
    %c0_i32_1 = arith.constant 0 : i32
    return %c0_i32, %c0_i32_0 : i32, i32
  }
  func.func @transform_3(%arg0: i32, %arg1: i32) -> (i32, i32) {
    %c0_i32 = arith.constant 0 : i32
    %c0_i32_0 = arith.constant 0 : i32
    %c0_i32_1 = arith.constant 0 : i32
    return %c0_i32, %c0_i32_0 : i32, i32
  }
  func.func @transform_4(%arg0: i32, %arg1: i32) -> (i32, i32, i32) {
    %c0_i32 = arith.constant 0 : i32
    %c0_i32_0 = arith.constant 0 : i32
    return %arg0, %c0_i32, %arg1 : i32, i32, i32
  }
}

</mosaic_0001>

<bundles_post_ra>
// kernel: tpu_custom_call.1
= control target key start
LH: loop header
LB: loop body
LE: loop exit
PB: predicated region body
PF: predicated region fallthrough
CT: control target
= control target key end

     0   :  { %s1583_s0 = inlined_call_operand.hbm [shape: bf16[2,16,768], index: 0, kind: input, shape index: {}]   ;;  %s1584_s1 = inlined_call_operand.hbm [shape: bf16[3,32,48], index: 1, kind: input, shape index: {}]   ;;  %s1585_s2 = inlined_call_operand.vmem [shape: f32[32,1], index: 2, kind: input, shape index: {}]   ;;  %s1586_s3 = inlined_call_operand.vmem [shape: bf16[8,32], index: 3, kind: input, shape index: {}]   ;;  %s1587_s4 = inlined_call_operand.hbm [shape: f32[2,8,512], index: 4, kind: output, shape index: {}]  }
   0x1   :  { %1600 = sst [smem:[#allocation19_spill]] %s1584_s1 }
   0x2   :  { %9 = vsyncpa [#allocation5], 0 }
   0x3   :  { %10 = vsyncpa [#allocation6], 0 }
   0x4   :  { %12 = vsyncpa [#allocation6 + $0x1], 0  ;;  %s1258_s15 = smov 0   ;;  %s1260_s16 = smov 0  }
   0x5   :  { %s1262_s17 = smov 0   ;;  %s1264_s18 = smov 0  }
   0x6   :  { %s1266_s19 = smov 0   ;;  %s1268_s20 = smov 0  }
   0x7   :  { %s1270_s21 = smov 0   ;;  %s1272_s22 = smov 0  }
   0x8 LB: > { %1601 = sst [smem:[#allocation13_spill]] %s1198_s17  ;;  %s811_s23 = sadd.s32 4294967295, %s1218_s22   ;;  %s1218_s22 = sphi %s1272_s22, %s18_s22   ;;  %s1214_s21 = sphi %s1270_s21, %s1626_s21   ;;  %s1210_s20 = sphi %s1268_s20, %s1625_s20   ;;  %s1206_s19 = sphi %s1266_s19, %s1624_s19   ;;  %s1202_s18 = sphi %s1264_s18, %s1623_s18   ;;  %s1198_s17 = sphi %s1262_s17, %s1622_s17   ;;  %s1194_s16 = sphi %s1260_s16, %s1628_s16   ;;  %s1190_s15 = sphi %s1258_s15, %s1627_s15  }
   0x9   : > { %1602 = sst [smem:[#allocation14_spill]] %s1210_s20  ;;  %s812_s24 = sadd.s32 4294967294, %s1218_s22  }
   0xa   : > { %1603 = sst [smem:[#allocation15_spill]] %s1214_s21  ;;  %s27_s25 = sadd.s32 1, %s1210_s20 }
   0xb   : > { %s30_s26 = sadd.s32 1, %s1214_s21  ;;  %p28_p0 = scmp.ge.s32.totalorder %s27_s25, 2 }
   0xc   : > { %s102_s27 = sadd.s32 1, %s1198_s17  ;;  %p112_p1 = scmp.ne.s32.totalorder %s1198_s17, %s1194_s16 }
   0xd   : > { %p113_p2 = scmp.eq.s32.totalorder %s811_s23, 3  ;;  %s1630_s25 = smov (%p28_p0, %s27_s25), 0 }
   0xe   : > { %1604 = sst [smem:[#allocation16_spill]] %s1630_s25  ;;  %s1632_s26 = smov (!%p28_p0, %s30_s26), %s1214_s21 }
   0xf   : > { %s98_s28 = ssub.s32 %s1210_s20, %s1630_s25  ;;  %p1310_p3 = por %p113_p2, %p112_p1 }
  0x10   : > { %p32_p4 = scmp.ge.s32.totalorder %s1632_s26, 2  ;;  %p118_p5 = scmp.ne.s32.totalorder %s1194_s16, %s1190_s15 }
  0x11   : > { %p119_p6 = scmp.eq.s32.totalorder %s812_s24, 3  ;;  %p813_p7 = scmp.ge.s32.totalorder %s1218_s22, 1 }
  0x12   : > { %s1634_s26 = smov (%p32_p4, %s1632_s26), 0  ;;  %p126_p9 = scmp.lt.s32.totalorder %s1218_s22, 5 }
  0x13   : > { %1606 = sst [smem:[#allocation17_spill]] %s1634_s26  ;;  %p1319_p8 = por %p119_p6, %p118_p5 }
  0x14   : > { %s97_s5 = ssub.s32 %s1214_s21, %s1634_s26  ;;  %p1326_p10 = pnand %p813_p7, %p126_p9 }
  0x15   : > { %s1607_s30 = scalar_select %p1319_p8, 1, 0 }
  0x16   : > { %s99_s6 = sor.u32 %s98_s28, %s97_s5  ;;  %p1330_p12 = scmp.eq.s32.totalorder %s811_s23, 0 }
  0x17   : > { %p100_p11 = scmp.eq.s32.totalorder %s99_s6, 0  ;;  %p940_p13 = pneg %p1326_p10 }
  0x18   : > { %s1610_s1 = sld [smem:[#allocation19_spill]]  ;;  %s1220_s13 = smov [#allocation4]  }
  0x19   : > { %s1340_s12 = scalar_select %p100_p11, %s1198_s17, %s102_s27  }
  0x1a   : > { %s139_s14 = sshll.u32 %s1220_s13, 4  ;;  %p941_p0 = pnand %p1330_p12, %p940_p13  ;;  %s140_s14 = int_to_ptr.vmem [resolvable:$true] %s139_s14 }
  0x1b   : > { %1611 = sst [smem:[#allocation18_spill]] %s1340_s12  ;;  %s1221_s24 = smov 64  }
  0x1c   : > { %s1222_s23 = smov 4   ;;  %161 = sbr.rel (%p1326_p10) target bundleno = 715 (0x2cb), region = 32 }
  0x1e   : > { %s137_s11 = sshll.u32 %s1610_s1, 4  ;;  %s138_s11 = int_to_ptr.hbm [resolvable:$true] %s137_s11 }
  0x1f   : > { %943 = dma.hbm_to_vmem [thread:$0]  (!%p941_p0), %s138_s11, 768, %s140_s14, [#allocation5], %s1221_s24, %s1221_s24, %s1222_s23  }
  0x21   : > { %1179 = dma.done.wait (%p1330_p12), [#allocation5], 768  }
  0x22   : > { %1181 = vsyncadd (%p1330_p12), [#allocation5], 4294966528  ;;  %s1588_s27 = sand.u32 1, %s1194_s16   ;;  %p183_p1 = scmp.lt.s32.totalorder %s1202_s18, 0 }
  0x23   : > { %s1354_s28 = sshll.u32 %s1588_s27, 4  ;;  %s184_s5 = ssub.s32 0, %s1202_s18 }
  0x24   : > { %s818_s6 = smin.u32 %s1202_s18, %s184_s5  ;;  %p950_p2 = scmp.eq.s32.totalorder %s1202_s18, 0 }
  0x25   : > { %s186_s7 = sand.u32 1, %s818_s6   ;;  %s1589_s9 = sshll.u32 %s1202_s18, 8 }
  0x26   : > { %s187_s8 = ssub.s32 0, %s186_s7  ;;  %s1591_s10 = smul.u32 12, %s1206_s19 }
  0x27   : > { %s1636_s8 = smov (!%p183_p1, %s187_s8), %s186_s7  ;;  %s200_s13 = sshra.s32 %s1589_s9, 7 }
  0x28   : > { %p820_p4 = scmp.lt.s32.totalorder %s1636_s8, 0  ;;  %s193_s11 = sadd.s32 2, %s1636_s8 }
  0x29   : > { %s203_s14 = sadd.s32 %s1591_s10, %s200_s13 }
  0x2a   : > { %s1638_s11 = smov (!%p820_p4, %s193_s11), %s1636_s8  ;;  %s823_s24 = sshll.u32 %s203_s14, 2 }
  0x2b   : > { %s911_s23 = sshll.u32 %s1638_s11, 5  ;;  %s205_s27 = scalar_lea.hbm %s1583_s0, %s823_s24 }
  0x2c   : > { %s210_s7 = sshll.u32 %s205_s27, 4  ;;  %s1373_s1 = scalar_lea.vmem [#allocation2], %s911_s23  ;;  %s1371_s7 = int_to_ptr.hbm [resolvable:$true] %s210_s7 }
  0x2d   : > { %s212_s9 = sshll.u32 %s1373_s1, 4  ;;  %s1379_s8 = scalar_lea.sflag [#allocation3], %s1638_s11  ;;  %s1376_s9 = int_to_ptr.vmem [resolvable:$true] %s212_s9 }
  0x2e   : > { %s1062_s26 = sshra.s32 %s1371_s7, 4  ;;  %s1594_s24 = scalar_lea.hbm %s1583_s0, 96  ;;  %s1063_s26 = int_to_ptr.hbm [resolvable:$true] %s1062_s26 }
  0x2f   : > { %s1064_s13 = scalar_lea.hbm %s1063_s26, 32  ;;  %p1069_p9 = scmp.lt.s32.totalorder %s1063_s26, %s1583_s0 }
  0x30   : > { %p1065_p5 = scmp.ne.s32.totalorder %s1063_s26, %s1064_s13  ;;  %p1070_p10 = scmp.lt.s32.totalorder %s1594_s24, %s1064_s13 }
  0x32   : > { %p1066_p6 = pnand %p1065_p5, %p950_p2  ;;  %p1071_p11 = por %p1070_p10, %p1069_p9 }
  0x34   : > { %p1067_p7 = pneg %p1066_p6 }
  0x36   : > { %p1072_p12 = pnand %p1071_p11, %p1067_p7 }
  0x38   : > { %1075 = shalt.err (!%p1072_p12)  }
  0x39   : > { %s1076_s25 = sshra.s32 %s1376_s9, 4  ;;  %s1223_s14 = smov [#allocation2]   ;;  %s1077_s25 = int_to_ptr.vmem [resolvable:$true] %s1076_s25 }
  0x3a   : > { %s1078_s21 = scalar_lea.vmem %s1077_s25, 32  ;;  %s1397_s27 = scalar_lea.vmem %s1223_s14, 64 }
  0x3b   : > { %p1079_p13 = scmp.ne.s32.totalorder %s1077_s25, %s1078_s21  ;;  %p1083_p4 = scmp.lt.s32.totalorder %s1077_s25, [#allocation2] }
  0x3c   : > { %p1084_p5 = scmp.lt.s32.totalorder %s1397_s27, %s1078_s21 }
  0x3d   : > { %p1080_p0 = pnand %p1079_p13, %p950_p2 }
  0x3e   : > { %p1085_p6 = por %p1084_p5, %p1083_p4 }
  0x3f   : > { %p1081_p1 = pneg %p1080_p0 }
  0x41   : > { %p1086_p8 = pnand %p1085_p6, %p1081_p1 }
  0x43   : > { %1089 = shalt.err (!%p1086_p8)  }
  0x44   : > { %s1595_s26 = smov 384   ;;  %s1596_s10 = smov 256  }
  0x45   : > { %s1597_s13 = smov 16   ;;  %s1409_s5 = scalar_lea.vmem [#allocation7], %s1354_s28 }
  0x46   : > { %935 = dma.hbm_to_vmem [thread:$0]  (%p950_p2), %s1371_s7, 512, %s1376_s9, %s1379_s8, %s1595_s26, %s1596_s10, %s1597_s13 }
  0x47   : > { %1182 = dma.done.wait %s1379_s8, 512 }
  0x48   : > { %1183 = vsyncadd %s1379_s8, 4294966784  ;;  %s226_s21 = sadd.s32 1, %s1202_s18  ;;  %s231_s25 = ssub.s32 1, %s1638_s11 }
  0x49   : > { %p1415_p8 = scmp.lt.s32.totalorder %s226_s21, 2  ;;  %s1613_s6 = sshll.u32 %s1202_s18, 8 }
  0x4a   : > { %s914_s14 = sadd.s32 256, %s1613_s6  ;;  %s915_s24 = sshll.u32 %s231_s25, 5 }
  0x4b   : > { %s233_s9 = sshra.s32 %s914_s14, 7  ;;  %s1614_s28 = smul.u32 12, %s1206_s19 }
  0x4c   : > { %s241_s10 = scalar_lea.vmem [#allocation2], %s915_s24  ;;  %s242_s12 = scalar_lea.sflag [#allocation3], %s231_s25 }
  0x4d   : > { %s236_s7 = sadd.s32 %s233_s9, %s1614_s28  ;;  %s1423_s8 = sshll.u32 %s241_s10, 4  ;;  %s246_s8 = int_to_ptr.vmem [resolvable:$true] %s1423_s8 }
  0x4e   : > { %s830_s26 = sshll.u32 %s236_s7, 2  ;;  %s1615_s20 = scalar_lea.hbm %s1583_s0, 96 }
  0x4f   : > { %s238_s11 = scalar_lea.hbm %s1583_s0, %s830_s26 }
  0x50   : > { %s243_s21 = sshll.u32 %s238_s11, 4  ;;  %s244_s21 = int_to_ptr.hbm [resolvable:$true] %s243_s21 }
  0x51   : > { %s1090_s17 = sshra.s32 %s244_s21, 4  ;;  %s1091_s17 = int_to_ptr.hbm [resolvable:$true] %s1090_s17 }
  0x52   : > { %s1092_s6 = scalar_lea.hbm %s1091_s17, 32  ;;  %p1097_p10 = scmp.lt.s32.totalorder %s1091_s17, %s1583_s0 }
  0x53   : > { %p1093_p2 = scmp.ne.s32.totalorder %s1091_s17, %s1092_s6  ;;  %p1098_p11 = scmp.lt.s32.totalorder %s1615_s20, %s1092_s6 }
  0x55   : > { %p1094_p7 = pnand %p1093_p2, %p1415_p8  ;;  %p1099_p12 = por %p1098_p11, %p1097_p10 }
  0x57   : > { %p1095_p9 = pneg %p1094_p7 }
  0x59   : > { %p1100_p13 = pnand %p1099_p12, %p1095_p9 }
  0x5b   : > { %1103 = shalt.err (!%p1100_p13)  }
  0x5c   : > { %s1104_s26 = sshra.s32 %s246_s8, 4  ;;  %s1105_s26 = int_to_ptr.vmem [resolvable:$true] %s1104_s26 }
  0x5d   : > { %s1106_s13 = scalar_lea.vmem %s1105_s26, 32  ;;  %p1111_p5 = scmp.lt.s32.totalorder %s1105_s26, [#allocation2] }
  0x5e   : > { %p1107_p0 = scmp.ne.s32.totalorder %s1105_s26, %s1106_s13  ;;  %p1112_p6 = scmp.lt.s32.totalorder %s1397_s27, %s1106_s13 }
  0x60   : > { %p1108_p1 = pnand %p1107_p0, %p1415_p8  ;;  %p1113_p2 = por %p1112_p6, %p1111_p5 }
  0x62   : > { %p1109_p4 = pneg %p1108_p1 }
  0x64   : > { %p1114_p7 = pnand %p1113_p2, %p1109_p4 }
  0x66   : > { %1117 = shalt.err (!%p1114_p7)  }
  0x67   : > { %s1616_s17 = smov 16   ;;  %s1617_s25 = smov 256   ;;  %vm283_vm0 = vcmask 1031168   ;;  %vm274_vm1 = vcmask 1039360   ;;  %vm363_vm2 = vcmask 7168   ;;  %vm376_vm3 = vcmask 392192  }
  0x68   : > { %s1618_s28 = smov 384   ;;  %s1227_s27 = smov 126   ;;  %vm449_vm4 = vcmask 154624   ;;  %vm547_vm5 = vcmask 908288   ;;  %vm657_vm6 = vcmask 261120  }
  0x69   : > { %937 = dma.hbm_to_vmem [thread:$0]  (%p1415_p8), %s244_s21, 512, %s246_s8, %s242_s12, %s1618_s28, %s1617_s25, %s1616_s17 }
  0x6a   : > { %v863_v0 = vld [vmem:[%s1373_s1 + $0xc] sm:$0xf]  ;;  %v925_v1 = vld [vmem:[%s1373_s1 + $0x18] sm:$0xf0]  ;;  %v855_v2 = vld [vmem:[%s1373_s1 + $0x4] sm:$0xf] }
  0x6b   : > { %v1453_v3 = vor.u32 %v925_v1, %v863_v0  ;;  %v924_v4 = vld [vmem:[%s1373_s1 + $0x10] sm:$0xf0]  ;;  %v847_v6 = vld [vmem:[%s1373_s1 + $0x4] sm:$0xf]  ;;  %v921_v8 = vld [vmem:[%s1373_s1 + $0x8] sm:$0xf] }
  0x6c   : > { %v1456_v5 = vor.u32 %v924_v4, %v855_v2  ;;  %v922_v7 = vld [vmem:[%s1373_s1 + $0x10] sm:$0xf0]  ;;  %v849_v9 = vld [vmem:[%s1373_s1 + $0x14] sm:$0xf0]  ;;  %v923_v10 = vld [vmem:[%s1373_s1 + $0x8] sm:$0xf] }
  0x6d   : > { %326 = vrot.lane.b32.xlu1 %v1453_v3, %s1227_s27  ;;  %v857_v11 = vld [vmem:[%s1373_s1 + $0x14] sm:$0xf0]  ;;  %v852_v12 = vor.u32 %v921_v8, %v849_v9  ;;  %v848_v13 = vor.u32 %v922_v7, %v847_v6  ;;  %s1228_s12 = smov 127   ;;  %v835_v15 = vld [vmem:[%s1373_s1] sm:$0xf]  ;;  %s1229_s23 = smov 1  }
  0x6e   : > { %322 = vrot.lane.b32.xlu0 %v1456_v5, %s1227_s27  ;;  %v1466_v14 = vor.u32 %v923_v10, %v857_v11  ;;  %v917_v16 = vld [vmem:[%s1373_s1 + $0xc] sm:$0xf0]  ;;  %v843_v18 = vld [vmem:[%s1373_s1 + $0x8] sm:$0xf]  ;;  %v918_v19 = vld [vmem:[%s1373_s1 + $0x14] sm:$0xf0] }
  0x6f   : > { %306 = vrot.lane.b32.xlu2 %v852_v12, %s1228_s12  ;;  %v836_v17 = vor.u32 %v917_v16, %v835_v15  ;;  %v916_v20 = vld [vmem:[%s1373_s1 + $0x4] sm:$0xf]  ;;  %v837_v21 = vld [vmem:[%s1373_s1 + $0x10] sm:$0xf0]  ;;  %v844_v22 = vor.u32 %v918_v19, %v843_v18  ;;  %s1230_s1 = smov 19   ;;  %s1231_s7 = smov 111  }
  0x70   : > { %v840_v23 = vor.u32 %v916_v20, %v837_v21  ;;  %v926_v1 = vld [vmem:[#allocation4 + $0x10] sm:$0xff]  ;;  %v612_v9 = vld [vmem:[%s1585_s2] sm:$0xff]  ;;  %v1232_v10 = vmov 0   ;;  %v927_v16 = vld [vmem:[#allocation4 + $0x18] sm:$0xff]  ;;  %s904_s13 = sshll.u32 %s1202_s18, 1  ;;  %s905_s17 = sshll.u32 %s1206_s19, 2 }
  0x71   : > { %1031 = vset.pattern.permute.xlu1 %v1232_v10  ;;  %1030 = vset.pattern.permute.xlu0 %v1232_v10  ;;  %s701_s25 = sadd.s32 %s905_s17, %s904_s13  ;;  %s1619_s8 = sand.u32 1, %s1194_s16  }
  0x72   : > { %1029 = vset.pattern.permute.xlu2 %v1232_v10  ;;  %s906_s28 = sshll.u32 %s701_s25, 3  ;;  %s690_s11 = scalar_lea.sflag [#allocation6], %s1619_s8 }
  0x73   : > { %s1138_s14 = scalar_lea.hbm %s1587_s4, 64 }
  0x75   : > { %304 = vrot.lane.b32.xlu1 %v848_v13, %s1228_s12 }
  0x76   : > { %324 = vrot.lane.b32.xlu0 %v1466_v14, %s1227_s27 }
  0x77   : > { %277 = vrot.lane.b32.xlu2 %v836_v17, %s1227_s27 }
  0x7d   : > { %281 = vrot.lane.b32.xlu1 %v844_v22, %s1227_s27 }
  0x7e   : > { %279 = vrot.lane.b32.xlu0 %v840_v23, %s1227_s27 }
  0x7f   : > { %268 = vrot.lane.b32.xlu2 %v836_v17, %s1228_s12 }
  0x85   : > { %272 = vrot.lane.b32.xlu1 %v844_v22, %s1228_s12 }
  0x86   : > { %270 = vrot.lane.b32.xlu0 %v840_v23, %s1228_s12 }
  0x87   : > { %506 = vrot.lane.b32.xlu2 %v1456_v5, %s1228_s12 }
  0x8d   : > { %510 = vrot.lane.b32.xlu1 %v1453_v3, %s1228_s12 }
  0x8e   : > { %508 = vrot.lane.b32.xlu0 %v1466_v14, %s1228_s12 }
  0x8f   : > { %345 = vrot.lane.b32.xlu2 %v836_v17, %s1229_s23 }
  0x95   : > { %349 = vrot.lane.b32.xlu1 %v844_v22, %s1229_s23 }
  0x96   : > { %347 = vrot.lane.b32.xlu0 %v840_v23, %s1229_s23 }
  0xc9   : > { %v307_v24 = vpop.permute.xlu2 %306 }
  0xca   : > { %355 = vrot.lane.b32.xlu1 %v307_v24, %s1229_s23 }
  0xd1   : > { %v278_v31 = vpop.permute.xlu2 %277 }
  0xd9   : > { %v269_v36 = vpop.permute.xlu2 %268 }
  0xdf   : > { %v327_v25 = vpop.permute.xlu1 %326 }
  0xe0   : > { %v323_v26 = vpop.permute.xlu0 %322 }
  0xe1   : > { %357 = vrot.lane.b32.xlu2 %v323_v26, %s1229_s23  ;;  %v507_v42 = vpop.permute.xlu2 %506 }
  0xe7   : > { %v305_v27 = vpop.permute.xlu1 %304 }
  0xe8   : > { %v325_v28 = vpop.permute.xlu0 %324  ;;  %v308_v35 = vsel %vm274_vm1, %v305_v27, %v307_v24 }
  0xe9   : > { %351 = vrot.lane.b32.xlu2 %v305_v27, %s1229_s23  ;;  %v328_v29 = vsel %vm283_vm0, %v323_v26, %v325_v28  ;;  %v329_v34 = vsel %vm283_vm0, %v325_v28, %v327_v25  ;;  %v346_v47 = vpop.permute.xlu2 %345  ;;  %v614_v26 = vld [vmem:[%s1585_s2 + $0x10] sm:$0xff] }
  0xea   : > { %359 = vrot.lane.b32.xlu0 %v328_v29, %s1229_s23 }
  0xef   : > { %v282_v30 = vpop.permute.xlu1 %281 }
  0xf0   : > { %447 = vrot.lane.b32.xlu1 %v282_v30, %s1230_s1  ;;  %v280_v32 = vpop.permute.xlu0 %279 }
  0xf1   : > { %431 = vrot.lane.b32.xlu2 %v836_v17, %s1230_s1  ;;  %v284_v33 = vsel %vm283_vm0, %v278_v31, %v280_v32  ;;  %v285_v40 = vsel %vm283_vm0, %v280_v32, %v282_v30  ;;  %v919_v17 = vld [vmem:[#allocation4] sm:$0xff]  ;;  %v613_v30 = vld [vmem:[%s1585_s2 + $0x8] sm:$0xff] }
  0xf2   : > { %433 = vrot.lane.b32.xlu0 %v840_v23, %s1230_s1  ;;  %v920_v31 = vld [vmem:[#allocation4 + $0x8] sm:$0xff] }
  0xf7   : > { %v273_v38 = vpop.permute.xlu1 %272 }
  0xf8   : > { %361 = vrot.lane.b32.xlu1 %v329_v34, %s1229_s23  ;;  %v271_v37 = vpop.permute.xlu0 %270 }
  0xf9   : > { %443 = vrot.lane.b32.xlu2 %v284_v33, %s1230_s1  ;;  %v275_v39 = vsel %vm274_vm1, %v269_v36, %v271_v37  ;;  %v276_v41 = vsel %vm274_vm1, %v271_v37, %v273_v38  ;;  %v928_v37 = vld [vmem:[#allocation4 + $0x20] sm:$0xff] }
  0xfa   : > { %353 = vrot.lane.b32.xlu0 %v308_v35, %s1229_s23  ;;  %s703_s23 = scalar_lea.hbm %s1587_s4, %s906_s28 }
  0xff   : > { %v511_v45 = vpop.permute.xlu1 %510 }
 0x100   : > { %441 = vrot.lane.b32.xlu1 %v273_v38, %s1230_s1  ;;  %v509_v43 = vpop.permute.xlu0 %508  ;;  %v929_v38 = vld [vmem:[#allocation4 + $0x28] sm:$0xff] }
 0x101   : > { %437 = vrot.lane.b32.xlu2 %v275_v39, %s1230_s1  ;;  %v512_v44 = vsel %vm274_vm1, %v507_v42, %v509_v43  ;;  %v513_v46 = vsel %vm274_vm1, %v509_v43, %v511_v45 }
 0x102   : > { %445 = vrot.lane.b32.xlu0 %v285_v40, %s1230_s1 }
 0x107   : > { %v350_v48 = vpop.permute.xlu1 %349 }
 0x108   : > { %435 = vrot.lane.b32.xlu1 %v844_v22, %s1230_s1  ;;  %v348_v50 = vpop.permute.xlu0 %347 }
 0x109   : > { %541 = vrot.lane.b32.xlu2 %v328_v29, %s1231_s7  ;;  %v364_v0 = vsel %vm363_vm2, %v346_v47, %v348_v50 }
 0x10a   : > { %439 = vrot.lane.b32.xlu0 %v276_v41, %s1230_s1  ;;  %s705_s1 = sshll.u32 %s1409_s5, 4  ;;  %s706_s1 = int_to_ptr.vmem [resolvable:$true] %s705_s1 }
 0x110   : > { %545 = vrot.lane.b32.xlu1 %v327_v25, %s1231_s7  ;;  %v615_v25 = vld [vmem:[%s1585_s2 + $0x18] sm:$0xff] }
 0x111   : > { %535 = vrot.lane.b32.xlu2 %v512_v44, %s1231_s7 }
 0x112   : > { %543 = vrot.lane.b32.xlu0 %v329_v34, %s1231_s7 }
 0x118   : > { %539 = vrot.lane.b32.xlu1 %v511_v45, %s1231_s7 }
 0x119   : > { %529 = vrot.lane.b32.xlu2 %v1456_v5, %s1231_s7 }
 0x11a   : > { %537 = vrot.lane.b32.xlu0 %v513_v46, %s1231_s7 }
 0x120   : > { %533 = vrot.lane.b32.xlu1 %v1453_v3, %s1231_s7  ;;  %v365_v3 = vsel %vm363_vm2, %v348_v50, %v350_v48 }
 0x121   : > { %628 = vperm.xlu2 %1029, %v614_v26  }
 0x122   : > { %531 = vrot.lane.b32.xlu0 %v1466_v14, %s1231_s7  ;;  %s707_s7 = sshll.u32 %s703_s23, 4  ;;  %s708_s7 = int_to_ptr.hbm [resolvable:$true] %s707_s7 }
 0x123   : > { %s1132_s21 = sshra.s32 %s708_s7, 4  ;;  %s1133_s21 = int_to_ptr.hbm [resolvable:$true] %s1132_s21 }
 0x124   : > { %s1134_s18 = scalar_lea.hbm %s1133_s21, 16  ;;  %p1139_p11 = scmp.lt.s32.totalorder %s1133_s21, %s1587_s4 }
 0x125   : > { %p1135_p8 = scmp.ne.s32.totalorder %s1133_s21, %s1134_s18  ;;  %p1140_p12 = scmp.lt.s32.totalorder %s1138_s14, %s1134_s18 }
 0x127   : > { %p1136_p9 = pnand %p1135_p8, %p1310_p3  ;;  %p1141_p13 = por %p1140_p12, %p1139_p11 }
 0x128   : > { %618 = vperm.xlu1 %1031, %v612_v9  }
 0x129   : > { %623 = vperm.xlu2 %1029, %v613_v30   ;;  %p1137_p10 = pneg %p1136_p9 }
 0x12a   : > { %633 = vperm.xlu0 %1030, %v615_v25  }
 0x12b   : > { %p1142_p0 = pnand %p1141_p13, %p1137_p10 }
 0x13b   : > { %v358_v49 = vpop.permute.xlu2 %357 }
 0x13c   : > { %v356_v51 = vpop.permute.xlu1 %355 }
 0x143   : > { %v352_v52 = vpop.permute.xlu2 %351 }
 0x14b   : > { %v432_v56 = vpop.permute.xlu2 %431 }
 0x153   : > { %v444_v62 = vpop.permute.xlu2 %443 }
 0x15b   : > { %v438_v7 = vpop.permute.xlu2 %437 }
 0x15c   : > { %v360_v53 = vpop.permute.xlu0 %359 }
 0x15d   : > { %v368_v54 = vsel %vm363_vm2, %v358_v49, %v360_v53 }
 0x15e   : > { %388 = vmatpush.bf16.msra.mxu0 %v368_v54 }
 0x162   : > { %v448_v55 = vpop.permute.xlu1 %447 }
 0x163   : > { %v542_v18 = vpop.permute.xlu2 %541 }
 0x164   : > { %v434_v57 = vpop.permute.xlu0 %433 }
 0x165   : > { %v450_v14 = vsel %vm449_vm4, %v432_v56, %v434_v57 }
 0x16a   : > { %v362_v58 = vpop.permute.xlu1 %361 }
 0x16b   : > { %v369_v59 = vsel %vm363_vm2, %v360_v53, %v362_v58  ;;  %v536_v23 = vpop.permute.xlu2 %535 }
 0x16c   : > { %v354_v60 = vpop.permute.xlu0 %353  ;;  %407 = vmatpush.bf16.msra.mxu1 %v369_v59 }
 0x16d   : > { %v366_v61 = vsel %vm363_vm2, %v352_v52, %v354_v60  ;;  %v367_v63 = vsel %vm363_vm2, %v354_v60, %v356_v51 }
 0x16e   : > { %389 = vmatpush.bf16.msra.mxu0 %v366_v61 }
 0x170   : > { %408 = vmatpush.bf16.msra.mxu1 %v367_v63 }
 0x172   : > { %390 = vmatpush.bf16.msra.mxu0 %v364_v0  ;;  %v442_v2 = vpop.permute.xlu1 %441 }
 0x173   : > { %v530_v33 = vpop.permute.xlu2 %529 }
 0x174   : > { %v446_v4 = vpop.permute.xlu0 %445  ;;  %409 = vmatpush.bf16.msra.mxu1 %v365_v3 }
 0x175   : > { %873 = vmatmul.msk.bf16.vlgmr.msra.gmra.mxu0 %vm376_vm3, %v926_v1  ;;  %v454_v5 = vsel %vm449_vm4, %v444_v62, %v446_v4  ;;  %v455_v6 = vsel %vm449_vm4, %v446_v4, %v448_v55 }
 0x176   : > { %473 = vmatpush.bf16.msra.mxu2 %v454_v5  ;;  %492 = vmatpush.bf16.msra.mxu3 %v455_v6 }
 0x177   : > { %875 = vmatmul.msk.bf16.vlgmr.msra.gmra.mxu1 %vm376_vm3, %v926_v1 }
 0x17a   : > { %v436_v8 = vpop.permute.xlu1 %435 }
 0x17b   : > { %v451_v15 = vsel %vm449_vm4, %v434_v57, %v436_v8  ;;  %v629_v57 = vpop.permute.xlu2 %628 }
 0x17c   : > { %v440_v11 = vpop.permute.xlu0 %439 }
 0x17d   : > { %v452_v12 = vsel %vm449_vm4, %v438_v7, %v440_v11  ;;  %v453_v13 = vsel %vm449_vm4, %v440_v11, %v442_v2 }
 0x17e   : > { %474 = vmatpush.bf16.msra.mxu2 %v452_v12  ;;  %493 = vmatpush.bf16.msra.mxu3 %v453_v13 }
 0x182   : > { %475 = vmatpush.bf16.msra.mxu2 %v450_v14  ;;  %494 = vmatpush.bf16.msra.mxu3 %v451_v15  ;;  %v546_v19 = vpop.permute.xlu1 %545 }
 0x183   : > { %v624_v6 = vpop.permute.xlu2 %623 }
 0x184   : > { %v544_v20 = vpop.permute.xlu0 %543 }
 0x185   : > { %874 = vmatmul.msk.bf16.gmra.mxu0 %vm376_vm3, %v927_v16  ;;  %885 = vmatmul.msk.bf16.vlgmr.msra.gmra.mxu2 %vm376_vm3, %v919_v17  ;;  %v552_v21 = vsel %vm547_vm5, %v542_v18, %v544_v20  ;;  %v553_v22 = vsel %vm547_vm5, %v544_v20, %v546_v19 }
 0x186   : > { %887 = vmatmul.msk.bf16.vlgmr.msra.gmra.mxu3 %vm376_vm3, %v919_v17  ;;  %571 = vmatpush.bf16.msrb.mxu0 %v552_v21 }
 0x187   : > { %590 = vmatpush.bf16.msrb.mxu1 %v553_v22 }
 0x188   : > { %876 = vmatmul.msk.bf16.gmra.mxu1 %vm376_vm3, %v927_v16 }
 0x18a   : > { %v540_v24 = vpop.permute.xlu1 %539 }
 0x18c   : > { %v538_v27 = vpop.permute.xlu0 %537 }
 0x18d   : > { %v550_v28 = vsel %vm547_vm5, %v536_v23, %v538_v27  ;;  %v551_v29 = vsel %vm547_vm5, %v538_v27, %v540_v24 }
 0x18e   : > { %572 = vmatpush.bf16.msrb.mxu0 %v550_v28  ;;  %591 = vmatpush.bf16.msrb.mxu1 %v551_v29 }
 0x192   : > { %v534_v32 = vpop.permute.xlu1 %533 }
 0x194   : > { %v532_v34 = vpop.permute.xlu0 %531 }
 0x195   : > { %886 = vmatmul.msk.bf16.gmra.mxu2 %vm376_vm3, %v920_v31  ;;  %v548_v35 = vsel %vm547_vm5, %v530_v33, %v532_v34  ;;  %v549_v36 = vsel %vm547_vm5, %v532_v34, %v534_v32 }
 0x196   : > { %888 = vmatmul.msk.bf16.gmra.mxu3 %vm376_vm3, %v920_v31  ;;  %573 = vmatpush.bf16.msrb.mxu0 %v548_v35 }
 0x197   : > { %592 = vmatpush.bf16.msrb.mxu1 %v549_v36 }
 0x199   : > { %897 = vmatmul.msk.bf16.vlgmr.msrb.gmra.mxu0 %vm376_vm3, %v928_v37 }
 0x19a   : > { %899 = vmatmul.msk.bf16.vlgmr.msrb.gmra.mxu1 %vm376_vm3, %v928_v37  ;;  %v619_v18 = vpop.permute.xlu1 %618 }
 0x19c   : > { %v634_v12 = vpop.permute.xlu0 %633 }
 0x1a9   : > { %898 = vmatmul.msk.bf16.gmra.mxu0 %vm376_vm3, %v929_v38 }
 0x1aa   : > { %900 = vmatmul.msk.bf16.gmra.mxu1 %vm376_vm3, %v929_v38 }
 0x1f2   : > { %v392_v39 = vpop.f32.mrf.mxu0 }
 0x1f4   : > { %v411_v40 = vpop.f32.mrf.mxu1 }
 0x1fa   : > { %v394_v41 = vpop.f32.mrf.mxu0 }
 0x1fc   : > { %v413_v42 = vpop.f32.mrf.mxu1 }
 0x202   : > { %v397_v43 = vpop.f32.mrf.mxu0 }
 0x205   : > { %v416_v44 = vpop.f32.mrf.mxu1 }
 0x208   : > { %v477_v45 = vpop.f32.mrf.mxu2 }
 0x209   : > { %v496_v46 = vpop.f32.mrf.mxu3  ;;  %v478_v4 = vadd.f32 %v477_v45, %v392_v39  ;;  %v656_v39 = vld [vmem:[%s1586_s3] sm:$0xf] }
 0x20a   : > { %v399_v48 = vpop.f32.mrf.mxu0  ;;  %v497_v8 = vadd.f32 %v496_v46, %v411_v40 }
 0x20d   : > { %v418_v47 = vpop.f32.mrf.mxu1 }
 0x210   : > { %v479_v49 = vpop.f32.mrf.mxu2 }
 0x211   : > { %v498_v51 = vpop.f32.mrf.mxu3  ;;  %v480_v63 = vadd.f32 %v479_v49, %v394_v41 }
 0x212   : > { %v499_v2 = vadd.f32 %v498_v51, %v413_v42 }
 0x216   : > { %v575_v50 = vpop.f32.mrf.mxu0 }
 0x217   : > { %v594_v52 = vpop.f32.mrf.mxu1  ;;  %v604_v13 = vadd.f32 %v575_v50, %v478_v4 }
 0x218   : > { %v482_v55 = vpop.f32.mrf.mxu2  ;;  %v605_v17 = vadd.f32 %v594_v52, %v497_v8 }
 0x219   : > { %v501_v56 = vpop.f32.mrf.mxu3  ;;  %v483_v60 = vadd.f32 %v482_v55, %v397_v43  ;;  %v636_v25 = vadd.f32 %v619_v18, %v604_v13 }
 0x21a   : > { %v502_v61 = vadd.f32 %v501_v56, %v416_v44  ;;  %v637_v28 = vadd.f32 %v619_v18, %v605_v17 }
 0x21b   : > { %v644_v35 = vmax.f32 %v636_v25, 0.0 }
 0x21c   : > { %v645_v36 = vmax.f32 %v637_v28, 0.0 }
 0x21e   : > { %v577_v53 = vpop.f32.mrf.mxu0 }
 0x21f   : > { %v596_v54 = vpop.f32.mrf.mxu1  ;;  %v606_v5 = vadd.f32 %v577_v53, %v480_v63 }
 0x220   : > { %v484_v62 = vpop.f32.mrf.mxu2  ;;  %v607_v9 = vadd.f32 %v596_v54, %v499_v2 }
 0x221   : > { %v503_v0 = vpop.f32.mrf.mxu3  ;;  %v485_v7 = vadd.f32 %v484_v62, %v399_v48  ;;  %v638_v21 = vadd.f32 %v624_v6, %v606_v5 }
 0x222   : > { %v504_v10 = vadd.f32 %v503_v0, %v418_v47  ;;  %v639_v23 = vadd.f32 %v624_v6, %v607_v9 }
 0x223   : > { %v646_v31 = vmax.f32 %v638_v21, 0.0 }
 0x224   : > { %v647_v33 = vmax.f32 %v639_v23, 0.0 }
 0x225   : > { %v652_v37 = vpack.c.bf16 %v646_v31, %v644_v35 }
 0x226   : > { %v580_v58 = vpop.f32.mrf.mxu0  ;;  %v653_v38 = vpack.c.bf16 %v647_v33, %v645_v36 }
 0x227   : > { %v599_v59 = vpop.f32.mrf.mxu1  ;;  %v608_v1 = vadd.f32 %v580_v58, %v483_v60 }
 0x228   : > { %v609_v3 = vadd.f32 %v599_v59, %v502_v61 }
 0x229   : > { %v640_v14 = vadd.f32 %v629_v57, %v608_v1 }
 0x22a   : > { %v641_v19 = vadd.f32 %v629_v57, %v609_v3 }
 0x22b   : > { %v648_v26 = vmax.f32 %v640_v14, 0.0 }
 0x22c   : > { %v649_v29 = vmax.f32 %v641_v19, 0.0 }
 0x22e   : > { %v582_v11 = vpop.f32.mrf.mxu0 }
 0x22f   : > { %v610_v15 = vadd.f32 %v582_v11, %v485_v7  ;;  %v601_v16 = vpop.f32.mrf.mxu1 }
 0x230   : > { %v611_v20 = vadd.f32 %v601_v16, %v504_v10 }
 0x231   : > { %v642_v22 = vadd.f32 %v634_v12, %v610_v15 }
 0x232   : > { %v643_v24 = vadd.f32 %v634_v12, %v611_v20 }
 0x233   : > { %v650_v27 = vmax.f32 %v642_v22, 0.0 }
 0x234   : > { %v651_v30 = vmax.f32 %v643_v24, 0.0 }
 0x235   : > { %v654_v32 = vpack.c.bf16 %v650_v27, %v648_v26 }
 0x236   : > { %v655_v34 = vpack.c.bf16 %v651_v30, %v649_v29 }
 0x237   : > { %667 = vmatpush.bf16.msrb.mxu2 %v654_v32 }
 0x238   : > { %680 = vmatpush.bf16.msrb.mxu3 %v655_v34 }
 0x23b   : > { %668 = vmatpush.bf16.msrb.mxu2 %v652_v37 }
 0x23c   : > { %681 = vmatpush.bf16.msrb.mxu3 %v653_v38 }
 0x23e   : > { %901 = vmatmul.msk.bf16.vlgmr.msrb.gmra.mxu2 %vm657_vm6, %v656_v39 }
 0x23f   : > { %902 = vmatmul.msk.bf16.vlgmr.msrb.gmra.mxu3 %vm657_vm6, %v656_v39 }
 0x2c1   : > { %v670_v40 = vpop.f32.mrf.mxu2 }
 0x2c2   : > { %687 = vst [vmem:[%s1409_s5] sm:$0xff] %v670_v40  ;;  %v683_v41 = vpop.f32.mrf.mxu3 }
 0x2c3   : > { %688 = vst [vmem:[%s1409_s5 + $0x8] sm:$0xff] %v683_v41 }
 0x2c4   : > { %1145 = shalt.err (!%p1142_p0)
}
 0x2c5   : > { %938 = dma.vmem_to_hbm [thread:$0]  (%p1310_p3), %s706_s1, 256, %s708_s7, %s690_s11  }
 0x2c9   : > { %v672_v42 = vpop.f32.mrf.mxu2 }
 0x2ca   : > { %v685_v43 = vpop.f32.mrf.mxu3 }
 0x2cb PF: > { %p952_p1 = scmp.ge.s32.totalorder %s1218_s22, 2  ;;  %s719_s5 = sand.u32 1, %s1190_s15  }
 0x2cc   : > { %p1620_p4 = scmp.ne.s32.totalorder %s1607_s30, 0  ;;  %s720_s9 = scalar_lea.sflag [#allocation6], %s719_s5 }
 0x2ce   : > { %p945_p5 = pnand %p952_p1, %p1620_p4 }
 0x2d0   : > { %p946_p6 = pneg %p945_p5 }
 0x2d2   : > { %1185 = dma.done.wait (%p946_p6), %s720_s9, 256  }
 0x2d3   : > { %1187 = vsyncadd (%p946_p6), %s720_s9, 4294967040  ;;  %s18_s22 = sadd.s32 1, %s1218_s22   ;;  %s1621_s29 = sld [smem:[#allocation13_spill]] }
 0x2d4   : > { %p15_p2 = scmp.ge.s32.totalorder %s18_s22, 6   ;;  %s1622_s17 = sld [smem:[#allocation18_spill]] }
 0x2d5   : > { %s1623_s18 = sld [smem:[#allocation14_spill]]  ;;  %s1627_s15 = smov %s1194_s16 }
 0x2d6   : > { %s1624_s19 = sld [smem:[#allocation15_spill]]  ;;  %17 = sbr.rel (!%p15_p2) target bundleno = 8 (0x8), region = 88 }
 0x2d7   : > { %s1625_s20 = sld [smem:[#allocation16_spill]] }
 0x2d8   : > { %s1626_s21 = sld [smem:[#allocation17_spill]] }
 0x2d9   : > { %s1628_s16 = smov %s1621_s29 }
 0x2db   :  { %726 = vsyncpa [#allocation5], 1 }
 0x2dc   :  { %728 = vsyncpa [#allocation5 + $0x1], 1 }
 0x2dd   :  { %729 = vsyncpa [#allocation6], 1 }
 0x2de   :  { %731 = vsyncpa [#allocation6 + $0x1], 1 }
 0x2df   :  { %732 = vsyncmov [#allocation3] }
 0x2e2   :  { %s733_s30 = vpop.sfrf %732 }
 0x2e3   :  { %p909_p3 = scmp.ne.s32.totalorder %s733_s30, 0 }
 0x2e5   :  { %737 = shalt.err (%p909_p3)  }
 0x2e6   :  { %739 = vsyncmov [#allocation3 + $0x1] }
 0x2e9   :  { %s740_s26 = vpop.sfrf %739 }
 0x2ea   :  { %p910_p7 = scmp.ne.s32.totalorder %s740_s26, 0 }
 0x2ec   :  { %744 = shalt.err (%p910_p7)  }

</bundles_post_ra>
